<compile_context>
chip_gen: v7x
topology: tpu7x:2x2x1
jax: 0.10.0
libtpu: 0.0.40
codegen_flags: <defaults>
</compile_context>

<pallas_src>
import jax
import jax.numpy as jnp
from jax.experimental import pallas as pl
from jax.experimental.pallas import tpu as pltpu


def _dilated_conv_kernel(x_ref, w_ref, o_ref):
    # x_ref: (2*C_in, TL), w_ref: (C_out, 2*C_in), o_ref: (C_out, TL)
    o_ref[...] = jnp.dot(
        w_ref[...], x_ref[...], preferred_element_type=jnp.float32
    ).astype(o_ref.dtype)


def _pick_l_tile(l_out, k_depth, c_out, itemsize,
                 vmem_budget_bytes=32 * 1024 * 1024, max_tile=2048):
    """Pick a lane-dense L tile (multiple of 128) that keeps the
    double-buffered working set (input + output blocks + weights) under a
    VMEM budget that is safe on v5e/v6e (128 MiB phys) and v7x (64 MiB)."""
    w_bytes = 2 * c_out * k_depth * itemsize            # double-buffered weight
    per_lane = 2 * (k_depth + c_out) * itemsize         # 2x (x block + out block)
    budget = max(vmem_budget_bytes - w_bytes, per_lane * 128)
    tl = min(budget // per_lane, max_tile)
    tl = max(128, (tl // 128) * 128)
    l_pad_min = ((l_out + 127) // 128) * 128            # never bigger than needed
    return min(tl, l_pad_min)


def dilated_causal_conv1d(x, weight, dilation, *, compute_dtype=None):
    """x: (N, C_in, L), weight: (C_out, C_in, 2) -> (N, C_out, L - dilation).

    compute_dtype: optionally e.g. jnp.bfloat16 to halve HBM traffic
    (accumulation stays f32 inside the kernel); default keeps x.dtype.
    """
    n, c_in, length = x.shape
    c_out, c_in_w, k = weight.shape
    assert k == 2 and c_in_w == c_in, "expected weight of shape (C_out, C_in, 2)"
    l_out = length - dilation  # kernel_size=2, VALID => L - dilation
    if l_out <= 0:
        raise ValueError(f"length ({length}) must exceed dilation ({dilation})")

    dtype = x.dtype if compute_dtype is None else jnp.dtype(compute_dtype)
    k_depth = 2 * c_in

    # Fused weight: (C_out, 2*C_in); lane axis = channels (no size-2 lane dim).
    w_cat = jnp.concatenate([weight[:, :, 0], weight[:, :, 1]], axis=1).astype(dtype)

    # Resolve the dilation shift outside the kernel; fuse both taps along C.
    x0 = x[:, :, :l_out]
    x1 = x[:, :, dilation:dilation + l_out]
    x_cat = jnp.concatenate([x0, x1], axis=1).astype(dtype)   # (N, 2*C_in, L_out)

    itemsize = jnp.dtype(dtype).itemsize
    tl = _pick_l_tile(l_out, k_depth, c_out, itemsize)
    l_pad = pl.cdiv(l_out, tl) * tl
    if l_pad != l_out:
        x_cat = jnp.pad(x_cat, ((0, 0), (0, 0), (0, l_pad - l_out)))

    grid = (n, l_pad // tl)

    cost = pl.CostEstimate(
        flops=2 * n * c_out * k_depth * l_pad,
        transcendentals=0,
        bytes_accessed=(n * k_depth * l_pad + c_out * k_depth
                        + n * c_out * l_pad) * itemsize,
    )

    out = pl.pallas_call(
        _dilated_conv_kernel,
        out_shape=jax.ShapeDtypeStruct((n, c_out, l_pad), dtype),
        grid_spec=pltpu.PrefetchScalarGridSpec(
            num_scalar_prefetch=0,
            grid=grid,
            in_specs=[
                # (2*C_in, TL) slab per (batch, L-tile); batch dim squeezed out.
                pl.BlockSpec((pl.Squeezed(), k_depth, tl), lambda b, l: (b, 0, l)),
                # Fused weight, same block every step (stays resident in VMEM).
                pl.BlockSpec((c_out, k_depth), lambda b, l: (0, 0)),
            ],
            out_specs=pl.BlockSpec((pl.Squeezed(), c_out, tl),
                                   lambda b, l: (b, 0, l)),
        ),
        compiler_params=pltpu.CompilerParams(
            dimension_semantics=("parallel", "parallel"),
            vmem_limit_bytes=48 * 1024 * 1024,   # safe on v5e/v6e/v7x
        ),
        cost_estimate=cost,
    )(x_cat, w_cat)

    # Drop the lane padding; cast back to the caller's dtype.
    return out[:, :, :l_out].astype(x.dtype)


def reference_conv1d(x, weight, dilation):
    # Plain-JAX reference (lax conv) for correctness check.
    return jax.lax.conv_general_dilated(
        x, weight,
        window_strides=(1,),
        padding="VALID",
        rhs_dilation=(dilation,),
        dimension_numbers=("NCH", "OIH", "NCH"),
    )


if __name__ == "__main__":
    key = jax.random.PRNGKey(0)
    kx, kw = jax.random.split(key)

    batch, in_channels, out_channels, length, dilation = 2, 4, 4, 16, 2

    x = jax.random.normal(kx, (batch, in_channels, length), dtype=jnp.float32)
    # Deterministic weight init (uniform like PyTorch Conv1d default scale).
    fan_in = in_channels * 2
    bound = 1.0 / (fan_in ** 0.5)
    weight = jax.random.uniform(
        kw, (out_channels, in_channels, 2),
        minval=-bound, maxval=bound, dtype=jnp.float32)

    y = dilated_causal_conv1d(x, weight, dilation)
    y = jax.block_until_ready(y)

    y_ref = reference_conv1d(x, weight, dilation)
    assert y.shape == (batch, out_channels, length - dilation), y.shape
    assert jnp.allclose(y, y_ref, atol=1e-5, rtol=1e-5), "mismatch vs reference"

    print("KERNEL_OK")
</pallas_src>

<mosaic_0001>
module attributes {stable_mosaic.version = 11 : i64} {
  func.func @_dilated_conv_kernel(%arg0: i32, %arg1: i32, %arg2: memref<1x8x128xf32, #tpu.memory_space<vmem>>, %arg3: memref<4x8xf32, #tpu.memory_space<vmem>>, %arg4: memref<1x4x128xf32, #tpu.memory_space<vmem>>) attributes {dimension_semantics = [#tpu.dimension_semantics<parallel>, #tpu.dimension_semantics<parallel>], iteration_bounds = array<i64: 2, 1>, scalar_prefetch = 0 : i64, scratch_operands = 0 : i64, tpu.core_type = #tpu.core_type<tc>, window_params = [{transform_indices = @transform_0, window_bounds = array<i64: 1, 8, 128>}, {pipeline_mode = #tpu.pipeline_mode<synchronous>, transform_indices = @transform_1, window_bounds = array<i64: 4, 8>}, {transform_indices = @transform_2, window_bounds = array<i64: 1, 4, 128>}]} {
    %c0 = arith.constant 0 : index
    %c0_0 = arith.constant 0 : index
    %0 = vector.load %arg3[%c0, %c0_0] : memref<4x8xf32, #tpu.memory_space<vmem>>, vector<4x8xf32>
    %c0_1 = arith.constant 0 : index
    %c0_2 = arith.constant 0 : index
    %c0_3 = arith.constant 0 : index
    %1 = vector.load %arg2[%c0_1, %c0_2, %c0_3] : memref<1x8x128xf32, #tpu.memory_space<vmem>>, vector<1x8x128xf32>
    %2 = vector.shape_cast %1 : vector<1x8x128xf32> to vector<8x128xf32>
    %cst = arith.constant dense<0.000000e+00> : vector<4x128xf32>
    %3 = tpu.matmul %0, %2, %cst {dimension_numbers = #tpu.dot_dimension_numbers<[1], [0], [0], [1], [0, 0, 1, 1], [], []>} : vector<4x8xf32>, vector<8x128xf32>, vector<4x128xf32> -> vector<4x128xf32>
    %c0_4 = arith.constant 0 : index
    %c0_5 = arith.constant 0 : index
    %c0_6 = arith.constant 0 : index
    %4 = vector.load %arg4[%c0_4, %c0_5, %c0_6] : memref<1x4x128xf32, #tpu.memory_space<vmem>>, vector<1x4x128xf32>
    %5 = vector.shape_cast %4 : vector<1x4x128xf32> to vector<4x128xf32>
    %6 = vector.shape_cast %3 : vector<4x128xf32> to vector<1x4x128xf32>
    tpu.vector_store %arg4[%c0_4, %c0_5, %c0_6], %6 {strides = array<i32>} : memref<1x4x128xf32, #tpu.memory_space<vmem>>, vector<1x4x128xf32>,
    return
  }
  func.func @transform_0(%arg0: i32, %arg1: i32) -> (i32, i32, i32) {
    %c0_i32 = arith.constant 0 : i32
    %c0_i32_0 = arith.constant 0 : i32
    return %arg0, %c0_i32, %arg1 : i32, i32, i32
  }
  func.func @transform_1(%arg0: i32, %arg1: i32) -> (i32, i32) {
    %c0_i32 = arith.constant 0 : i32
    %c0_i32_0 = arith.constant 0 : i32
    %c0_i32_1 = arith.constant 0 : i32
    return %c0_i32, %c0_i32_0 : i32, i32
  }
  func.func @transform_2(%arg0: i32, %arg1: i32) -> (i32, i32, i32) {
    %c0_i32 = arith.constant 0 : i32
    %c0_i32_0 = arith.constant 0 : i32
    return %arg0, %c0_i32, %arg1 : i32, i32, i32
  }
}

</mosaic_0001>

<bundles_post_ra>
// kernel: tpu_custom_call.1
= control target key start
LH: loop header
LB: loop body
LE: loop exit
PB: predicated region body
PF: predicated region fallthrough
CT: control target
= control target key end

     0   :  { %7 = vsyncpa [#allocation3], 0  ;;  %s852_s0 = inlined_call_operand.hbm [shape: f32[2,8,128], index: 0, kind: input, shape index: {}]   ;;  %s853_s1 = inlined_call_operand.hbm [shape: f32[4,8], index: 1, kind: input, shape index: {}]   ;;  %s854_s2 = inlined_call_operand.hbm [shape: f32[2,4,128], index: 2, kind: output, shape index: {}]  }
   0x1   :  { %9 = vsyncpa [#allocation3 + $0x1], 0 }
   0x2   :  { %10 = vsyncpa [#allocation6], 0 }
   0x3   :  { %11 = vsyncpa [#allocation4], 0 }
   0x4   :  { %13 = vsyncpa [#allocation4 + $0x1], 0  ;;  %s635_s9 = smov 0   ;;  %s637_s10 = smov 0  }
   0x5   :  { %s639_s11 = smov 0   ;;  %s641_s12 = smov 0  }
   0x6   :  { %s643_s13 = smov 0   ;;  %s645_s14 = smov 0  }
   0x7 LB: > { %s371_s15 = sadd.s32 4294967295, %s613_s14   ;;  %s372_s16 = sadd.s32 4294967294, %s613_s14   ;;  %s613_s14 = sphi %s645_s14, %s19_s14   ;;  %s609_s13 = sphi %s643_s13, %s879_s13   ;;  %s605_s12 = sphi %s641_s12, %s878_s12   ;;  %s601_s11 = sphi %s639_s11, %s877_s11   ;;  %s597_s10 = sphi %s637_s10, %s876_s10   ;;  %s593_s9 = sphi %s635_s9, %s875_s9  }
   0x8   : > { %p53_p0 = scmp.ne.s32.totalorder %s597_s10, %s593_s9  ;;  %p669_p1 = scmp.eq.s32.totalorder %s371_s15, 0 }
   0x9   : > { %p673_p2 = scmp.eq.s32.totalorder %s371_s15, 1  ;;  %p106_p3 = scmp.eq.s32.totalorder %s372_s16, 1 }
   0xa   : > { %s859_s17 = scalar_select %p669_p1, 1, 0 }
   0xb   : > { %s860_s18 = scalar_select %p673_p2, 1, 0 }
   0xc   : > { %p679_p4 = por %p669_p1, %p53_p0  ;;  %p373_p5 = scmp.ge.s32.totalorder %s613_s14, 1 }
   0xd   : > { %p684_p6 = por %p106_p3, %p53_p0  ;;  %p113_p7 = scmp.lt.s32.totalorder %s613_s14, 3 }
   0xe   : > { %s861_s19 = scalar_select %p679_p4, 1, 0 }
   0xf   : > { %s862_s20 = scalar_select %p684_p6, 1, 0 }
  0x10   : > { %p689_p8 = pnand %p373_p5, %p113_p7  ;;  %s615_s22 = smov [#allocation5]  }
  0x11   : > { %s126_s23 = sshll.u32 %s615_s22, 4  ;;  %s31_s25 = sadd.s32 1, %s609_s13  ;;  %s127_s23 = int_to_ptr.vmem [resolvable:$true] %s126_s23 }
  0x12   : > { %s863_s21 = scalar_select %p689_p8, 1, 0 }
  0x13   : > { %p402_p10 = pneg %p689_p8  ;;  %s40_s26 = sadd.s32 1, %s601_s11 }
  0x14   : > { %p704_p12 = scmp.ge.s32.totalorder %s31_s25, 2  ;;  %s469_s30 = scalar_lea.hbm %s853_s1, 64 }
  0x15   : > { %p698_p11 = pnand %p402_p10, %p669_p1  ;;  %p470_p13 = scmp.ne.s32.totalorder %s853_s1, %s469_s30 }
  0x16   : > { %s865_s27 = scalar_select %p704_p12, 1, 0 }
  0x17   : > { %p471_p0 = pneg %p698_p11  ;;  %p476_p7 = scmp.lt.u32.totalorder %s469_s30, %s853_s1 }
  0x19   : > { %p472_p3 = pnand %p471_p0, %p470_p13 }
  0x1b   : > { %p473_p5 = pneg %p472_p3 }
  0x1d   : > { %p478_p10 = pnand %p476_p7, %p473_p5 }
  0x1f   : > { %481 = shalt.err (!%p478_p10)
}
  0x20   : > { %s482_s7 = scalar_lea.vmem %s127_s23, 64  ;;  %p490_p4 = scmp.lt.s32.totalorder %s127_s23, %s127_s23 }
  0x21   : > { %p483_p9 = scmp.ne.s32.totalorder %s127_s23, %s482_s7  ;;  %p491_p8 = scmp.lt.s32.totalorder %s482_s7, %s482_s7 }
  0x23   : > { %p485_p6 = pnand %p483_p9, %p471_p0  ;;  %p492_p2 = por %p491_p8, %p490_p4 }
  0x25   : > { %p486_p1 = pneg %p485_p6 }
  0x27   : > { %p493_p12 = pnand %p492_p2, %p486_p1 }
  0x29   : > { %496 = shalt.err (!%p493_p12)
}
  0x2a   : > { %405 = dma.hbm_to_vmem [thread:$0]  (!%p698_p11), %s853_s1, 64, %s127_s23, [#allocation6]  }
  0x2b   : > { %p866_p4 = scmp.ne.s32.totalorder %s865_s27, 0  ;;  %p47_p1 = scmp.ne.s32.totalorder %s601_s11, %s597_s10 }
  0x2c   : > { %p48_p2 = scmp.eq.s32.totalorder %s613_s14, 0  ;;  %p415_p6 = scmp.lt.s32.totalorder %s613_s14, 2 }
  0x2d   : > { %s881_s25 = smov (%p866_p4, %s31_s25), 0  ;;  %p867_p12 = scmp.ne.s32.totalorder %s860_s18, 0 }
  0x2e   : > { %s35_s16 = ssub.s32 %s609_s13, %s881_s25  ;;  %p49_p9 = por %p48_p2, %p47_p1 }
  0x2f   : > { %p38_p8 = scmp.eq.s32.totalorder %s35_s16, 0  ;;  %p736_p13 = por %p867_p12, %p47_p1 }
  0x30   : > { %s137_s24 = sand.u32 1, %s601_s11   ;;  %s377_s27 = sshll.u32 %s609_s13, 7 }
  0x31   : > { %s744_s28 = scalar_select %p38_p8, %s601_s11, %s40_s26  }
  0x32   : > { %s376_s23 = sshll.u32 %s137_s24, 3  ;;  %s750_s3 = scalar_lea.hbm %s852_s0, %s377_s27 }
  0x33   : > { %s141_s18 = scalar_lea.vmem [#allocation2], %s376_s23  ;;  %p754_p11 = pnand %p415_p6, %p49_p9 }
  0x34   : > { %s149_s4 = sshll.u32 %s141_s18, 4  ;;  %s138_s26 = scalar_lea.sflag [#allocation3], %s137_s24  ;;  %s752_s4 = int_to_ptr.vmem [resolvable:$true] %s149_s4 }
  0x35   : > { %s497_s6 = scalar_lea.hbm %s750_s3, 128  ;;  %p499_p3 = pneg %p754_p11 }
  0x36   : > { %p498_p0 = scmp.ne.s32.totalorder %s750_s3, %s497_s6  ;;  %s502_s15 = scalar_lea.hbm %s852_s0, 256 }
  0x37   : > { %p503_p10 = scmp.lt.u32.totalorder %s750_s3, %s852_s0  ;;  %p504_p4 = scmp.lt.u32.totalorder %s502_s15, %s497_s6 }
  0x38   : > { %p500_p5 = pnand %p499_p3, %p498_p0  ;;  %p506_p2 = scmp.lt.u32.totalorder %s497_s6, %s750_s3 }
  0x39   : > { %p505_p1 = por %p504_p4, %p503_p10 }
  0x3a   : > { %p501_p7 = pneg %p500_p5 }
  0x3b   : > { %p507_p6 = por %p506_p2, %p505_p1 }
  0x3d   : > { %p508_p8 = pnand %p507_p6, %p501_p7 }
  0x3f   : > { %511 = shalt.err (!%p508_p8)
}
  0x40   : > { %s512_s24 = scalar_lea.vmem %s752_s4, 128  ;;  %s616_s27 = smov [#allocation2]  }
  0x41   : > { %p513_p9 = scmp.ne.s32.totalorder %s752_s4, %s512_s24  ;;  %s517_s29 = sshll.u32 %s616_s27, 4  ;;  %s518_s29 = int_to_ptr.vmem [resolvable:$false] %s517_s29 }
  0x42   : > { %s519_s30 = scalar_lea.vmem %s518_s29, 256  ;;  %p520_p5 = scmp.lt.s32.totalorder %s752_s4, %s518_s29 }
  0x43   : > { %p515_p12 = pnand %p513_p9, %p499_p3  ;;  %p521_p10 = scmp.lt.s32.totalorder %s519_s30, %s512_s24 }
  0x45   : > { %p516_p0 = pneg %p515_p12  ;;  %p522_p4 = por %p521_p10, %p520_p5 }
  0x47   : > { %p523_p1 = pnand %p522_p4, %p516_p0 }
  0x49   : > { %526 = shalt.err (!%p523_p1)
}
  0x4a   : > { %409 = dma.hbm_to_vmem [thread:$0]  (!%p754_p11), %s750_s3, 128, %s752_s4, %s138_s26  }
  0x4b   : > { %p870_p7 = scmp.ne.s32.totalorder %s863_s21, 0 }
  0x4c   : > { %s786_s18 = sand.u32 (!%p870_p7), 1, %s597_s10   ;;  %p871_p3 = scmp.ne.s32.totalorder (!%p870_p7), %s861_s19, 0 }
  0x4d   : > { %158 = sbr.rel (%p870_p7) target bundleno = 317 (0x13d), region = 28  ;;  %s379_s6 = sshll.u32 (!%p870_p7), %s786_s18, 3 }
  0x4e   : > { %s161_s7 = scalar_lea.sflag (!%p870_p7), [#allocation3], %s786_s18  ;;  %s164_s8 = scalar_lea.vmem (!%p870_p7), [#allocation2], %s379_s6 }
  0x54   : > { %580 = dma.done.wait (%p871_p3), %s161_s7, 128  }
  0x55   : > { %582 = vsyncadd (%p871_p3), %s161_s7, 4294967168  ;;  %p872_p2 = scmp.ne.s32.totalorder %s859_s17, 0 }
  0x57   : > { %584 = dma.done.wait (%p872_p2), [#allocation6], 64  }
  0x58   : > { %586 = vsyncadd (%p872_p2), [#allocation6], 4294967232  ;;  %v617_v0 = vmov 0.0   ;;  %vm618_vm0 = vmmov 0   ;;  %vm191_vm1 = vcmask 64512   ;;  %v190_v1 = vld [vmem:[%s164_s8] sm:$0xff] }
  0x59   : > { %389 = vmatprep.subr.mxu0 %v617_v0  ;;  %391 = vmatprep.mubr.msk.f32.mxu0 %vm618_vm0, %v617_v0  ;;  %v189_v2 = vld [vmem:[#allocation5] sm:$0xf]  ;;  %s381_s19 = sshll.u32 %s786_s18, 2  ;;  %s384_s4 = sshll.u32 %s605_s12, 6 }
  0x5a   : > { %390 = vmatpush3.msra.mxu0 %v190_v1  ;;  %s188_s21 = scalar_lea.vmem [#allocation7], %s381_s19  ;;  %s805_s26 = scalar_lea.hbm %s854_s2, %s384_s4 }
  0x5b   : > { %392 = vmatmul.mubr.msk.f32.vlgmr.msra.gmra.mrb[0].mxu0 %vm191_vm1, %v189_v2  ;;  %s281_s3 = sshll.u32 %s188_s21, 4  ;;  %s267_s15 = scalar_lea.sflag [#allocation4], %s786_s18  ;;  %s800_s3 = int_to_ptr.vmem [resolvable:$true] %s281_s3 }
  0x5c   : > { %s527_s16 = scalar_lea.vmem %s800_s3, 64  ;;  %s619_s12 = smov [#allocation7]  }
  0x5d   : > { %p528_p11 = scmp.ne.s32.totalorder %s800_s3, %s527_s16  ;;  %s531_s23 = sshll.u32 %s619_s12, 4  ;;  %s532_s23 = int_to_ptr.vmem [resolvable:$false] %s531_s23 }
  0x5e   : > { %s533_s24 = scalar_lea.vmem %s532_s23, 128  ;;  %p534_p9 = scmp.lt.s32.totalorder %s800_s3, %s532_s23 }
  0x5f   : > { %p529_p6 = pnand %p528_p11, %p736_p13  ;;  %p535_p12 = scmp.lt.s32.totalorder %s533_s24, %s527_s16 }
  0x61   : > { %p530_p8 = pneg %p529_p6  ;;  %p536_p0 = por %p535_p12, %p534_p9 }
  0x63   : > { %p537_p5 = pnand %p536_p0, %p530_p8 }
 0x12e   : > { %v261_v3 = vpop.f32.mrb[0].mxu0 }
 0x12f   : > { %265 = vst [vmem:[%s188_s21] sm:$0xf] %v261_v3  ;;  %v393_v4 = vpop.f32.mrb[1].mxu0 }
 0x130   : > { %540 = shalt.err (!%p537_p5)
}
 0x131   : > { %s541_s27 = scalar_lea.hbm %s805_s26, 64  ;;  %s545_s18 = scalar_lea.hbm %s854_s2, 128 }
 0x132   : > { %p542_p10 = scmp.ne.s32.totalorder %s805_s26, %s541_s27  ;;  %p546_p7 = scmp.lt.u32.totalorder %s805_s26, %s854_s2 }
 0x133   : > { %p547_p3 = scmp.lt.u32.totalorder %s545_s18, %s541_s27  ;;  %p549_p11 = scmp.lt.u32.totalorder %s541_s27, %s805_s26 }
 0x134   : > { %p543_p4 = pnand %p542_p10, %p736_p13 }
 0x135   : > { %p548_p2 = por %p547_p3, %p546_p7 }
 0x136   : > { %p544_p1 = pneg %p543_p4 }
 0x137   : > { %p550_p6 = por %p549_p11, %p548_p2 }
 0x139   : > { %p551_p8 = pnand %p550_p6, %p544_p1 }
 0x13b   : > { %554 = shalt.err (!%p551_p8)
}
 0x13c   : > { %400 = dma.vmem_to_hbm [thread:$0]  (%p736_p13), %s800_s3, 64, %s805_s26, %s267_s15  }
 0x13d PF: > { %s293_s8 = sand.u32 1, %s593_s9   ;;  %p873_p9 = scmp.ne.s32.totalorder %s862_s20, 0 }
 0x13e   : > { %p874_p12 = scmp.ge.s32.totalorder %s613_s14, 2  ;;  %s294_s19 = scalar_lea.sflag [#allocation4], %s293_s8 }
 0x140   : > { %p411_p0 = pnand %p874_p12, %p873_p9 }
 0x142   : > { %588 = dma.done.wait (!%p411_p0), %s294_s19, 64  }
 0x143   : > { %590 = vsyncadd (!%p411_p0), %s294_s19, 4294967232  ;;  %s19_s14 = sadd.s32 1, %s613_s14   ;;  %s875_s9 = smov %s597_s10 }
 0x144   : > { %p16_p5 = scmp.ge.s32.totalorder %s19_s14, 4   ;;  %s876_s10 = smov %s601_s11 }
 0x145   : > { %s877_s11 = smov %s744_s28  ;;  %s878_s12 = smov %s609_s13 }
 0x146   : > { %s879_s13 = smov %s881_s25  ;;  %18 = sbr.rel (!%p16_p5) target bundleno = 7 (0x7), region = 77 }
 0x14d   :  { %299 = vsyncpa [#allocation3], 1 }
 0x14e   :  { %301 = vsyncpa [#allocation3 + $0x1], 1 }
 0x14f   :  { %302 = vsyncpa [#allocation6], 1 }
 0x150   :  { %303 = vsyncpa [#allocation4], 1 }
 0x151   :  { %305 = vsyncpa [#allocation4 + $0x1], 1 }

</bundles_post_ra>
